<compile_context>
chip_gen: v6e
topology: v6e:2x2x1
jax: 0.10.0
libtpu: 0.0.40
codegen_flags: <defaults>
</compile_context>

<pallas_src>
import jax
import jax.numpy as jnp
from jax.experimental import pallas as pl
from jax.experimental.pallas import tpu as pltpu


def _round_up(x, m):
    return ((x + m - 1) // m) * m


def _chip_info():
    """Returns (generation tag, VMEM capacity in bytes) for tiling decisions."""
    kind = ""
    try:
        kind = jax.devices()[0].device_kind.lower()
    except Exception:
        pass
    if "v7" in kind:
        gen = "v7x"
    elif "v6" in kind:
        gen = "v6e"
    elif "v5" in kind and ("lite" in kind or "v5e" in kind):
        gen = "v5e"
    elif "v5" in kind:
        gen = "v5p"
    else:
        gen = "unknown"
    vmem_cap = None
    try:
        vmem_cap = getattr(pltpu.get_tpu_info(), "vmem_capacity_bytes", None)
    except Exception:
        vmem_cap = None
    if vmem_cap is None:
        vmem_cap = (64 << 20) if gen in ("v7x", "unknown") else (128 << 20)
    return gen, int(vmem_cap)


def _make_dense_kernel(x_full_k, tk, use_acc_scratch):
    """Grid = (M tiles, N tiles, K tiles); K is the last ('arbitrary') reduction axis."""

    def kernel(x_ref, w_ref, b_ref, o_ref, *scratch):
        acc_ref = scratch[0] if use_acc_scratch else o_ref
        k = pl.program_id(2)

        @pl.when(k == 0)
        def _init():
            acc_ref[...] = jnp.zeros_like(acc_ref)

        if x_full_k:
            # x block covers the full (padded) K dimension; slice out this
            # K chunk (lane-aligned: tk is a multiple of 128).
            start = pl.multiple_of(k * tk, tk)
            x_blk = x_ref[:, pl.ds(start, tk)]
        else:
            x_blk = x_ref[...]

        # MXU matmul with f32 accumulation regardless of operand dtype.
        acc_ref[...] += jnp.dot(x_blk, w_ref[...],
                                preferred_element_type=jnp.float32)

        @pl.when(k == pl.num_programs(2) - 1)
        def _finalize():
            # Bias add happens once, after the K reduction is complete.
            if use_acc_scratch:
                o_ref[...] = (acc_ref[...] + b_ref[...]).astype(o_ref.dtype)
            else:
                o_ref[...] = acc_ref[...] + b_ref[...]

    return kernel


class Dense:
    """y = einsum('ni,io->no', x, weight) + bias, parameters prepared once."""

    def __init__(self, weight, bias, *, compute_dtype=None, tm=None, tn=None, tk=None):
        in_dim, out_dim = weight.shape
        assert bias.shape == (out_dim,)
        self.in_dim, self.out_dim = in_dim, out_dim
        self.gen, self.vmem_cap = _chip_info()

        # Compute dtype: bf16 by default on v5e (no native f32 MXU path there),
        # otherwise keep the parameter dtype. Accumulation is always f32.
        if compute_dtype is None:
            compute_dtype = jnp.bfloat16 if self.gen == "v5e" else weight.dtype
        self.compute_dtype = jnp.dtype(compute_dtype)
        cdt_size = self.compute_dtype.itemsize
        self.sublane = max(8, 32 // cdt_size)   # 8 f32 / 16 bf16 / 32 int8-fp8

        # Per-generation tile defaults and VMEM budget.
        if self.gen in ("v6e", "v5p"):
            tm_d, tn_d = 1024, 1024
            tk_d = 2048 if cdt_size <= 2 else 1024
            budget = min(100 << 20, self.vmem_cap - (16 << 20))
        elif self.gen == "v5e":
            tm_d, tn_d = 512, 512
            tk_d = 2048 if cdt_size <= 2 else 1024
            budget = min(96 << 20, self.vmem_cap - (16 << 20))
        else:  # v7x / unknown: assume 64 MiB VMEM, stay well under it.
            tm_d, tn_d = 512, 512
            tk_d = 1024
            budget = min(48 << 20, self.vmem_cap - (12 << 20))
        self.budget = max(int(budget), 32 << 20)

        if tm is not None:
            tm_d = tm
        if tn is not None:
            tn_d = tn
        if tk is not None:
            tk_d = tk

        out_full = _round_up(out_dim, 128)
        in_full = _round_up(in_dim, 128)
        tm_e = tm_d                       # clamped per call to round_up(N, sublane)
        tn_e = min(tn_d, out_full)
        tk_e = min(tk_d, in_full)

        # v7x has 2 TensorCores: make sure small layers get >= 2 tiles along a
        # 'parallel' axis by splitting the output columns when possible.
        if self.gen == "v7x" and tn_e >= out_full and out_full >= 256 and out_full % 256 == 0:
            tn_e = out_full // 2

        def _half_mult(v, mult):
            return max(mult, ((v // 2) // mult) * mult)

        def _est(tm_, tn_, tk_):
            in_pad_ = _round_up(in_dim, tk_)
            nk_ = in_pad_ // tk_
            stripe = 2 * tm_ * in_pad_ * cdt_size
            x_bytes = stripe if (nk_ > 1 and stripe <= self.budget // 3) \
                else 2 * tm_ * tk_ * cdt_size
            w_bytes = 2 * tk_ * tn_ * cdt_size
            o_bytes = 2 * tm_ * tn_ * 4          # worst case: f32 output
            a_bytes = tm_ * tn_ * 4              # worst case: scratch accumulator
            b_bytes = 2 * tn_ * 4
            return x_bytes + w_bytes + o_bytes + a_bytes + b_bytes

        # Shrink tiles until the double-buffered working set fits the budget.
        while _est(tm_e, tn_e, tk_e) > self.budget:
            if tk_e > 512:
                tk_e = _half_mult(tk_e, 128)
            elif tn_e > 256:
                tn_e = _half_mult(tn_e, 128)
            elif tm_e > 256:
                tm_e = _half_mult(tm_e, self.sublane)
            elif tk_e > 128:
                tk_e = _half_mult(tk_e, 128)
            elif tn_e > 128:
                tn_e = _half_mult(tn_e, 128)
            elif tm_e > self.sublane:
                tm_e = _half_mult(tm_e, self.sublane)
            else:
                break

        self.tm_max, self.tn, self.tk = tm_e, tn_e, tk_e
        self.in_pad = _round_up(in_dim, tk_e)
        self.out_pad = _round_up(out_dim, tn_e)
        self.vmem_limit = int(self.budget)

        # ---- Parameter preparation (ONCE, hoisted out of the forward path) ----
        w_p = weight
        if (self.in_pad, self.out_pad) != (in_dim, out_dim):
            w_p = jnp.pad(weight, ((0, self.in_pad - in_dim),
                                   (0, self.out_pad - out_dim)))
        self.w_p = w_p.astype(self.compute_dtype)
        b_p = bias if self.out_pad == out_dim else jnp.pad(bias, (0, self.out_pad - out_dim))
        # Bias stays f32: it is added once to the f32 accumulator in the epilogue.
        self.b2d = b_p.astype(jnp.float32).reshape(1, self.out_pad)
        # TODO(synk): optional fp8 weight/activation path on v7x (fp8 operands,
        # f32 accumulation) to halve streamed weight bytes when accuracy allows.

    def __call__(self, x, is_t=False):
        # `is_t` is unused — kept for signature parity with the PyTorch module.
        N, in_dim = x.shape
        assert in_dim == self.in_dim
        out_dtype = x.dtype
        cdt = self.compute_dtype
        cdt_size = cdt.itemsize

        tm = min(self.tm_max, _round_up(N, self.sublane))
        n_pad = _round_up(N, tm)
        tn, tk = self.tn, self.tk
        in_pad, out_pad = self.in_pad, self.out_pad
        nk = in_pad // tk

        # Only the (small) activation is padded / cast per call.
        x_p = x
        if (n_pad, in_pad) != (N, in_dim):
            x_p = jnp.pad(x, ((0, n_pad - N), (0, in_pad - in_dim)))
        if x_p.dtype != cdt:
            x_p = x_p.astype(cdt)

        # K-resident x stripe: load each row stripe once per i; only W streams.
        x_full_k = nk > 1 and (2 * tm * in_pad * cdt_size) <= self.budget // 3
        # Accumulate directly into the resident f32 output block when possible.
        use_acc_scratch = jnp.dtype(out_dtype) != jnp.dtype(jnp.float32)

        if x_full_k:
            x_spec = pl.BlockSpec((tm, in_pad), lambda i, j, k: (i, 0))
        else:
            x_spec = pl.BlockSpec((tm, tk), lambda i, j, k: (i, k))

        kernel = _make_dense_kernel(x_full_k, tk, use_acc_scratch)
        scratch = [pltpu.VMEM((tm, tn), jnp.float32)] if use_acc_scratch else []

        grid = (n_pad // tm, out_pad // tn, nk)
        cost = pl.CostEstimate(
            flops=2 * N * in_dim * self.out_dim,
            transcendentals=0,
            bytes_accessed=int(n_pad * in_pad * cdt_size
                               + in_pad * out_pad * cdt_size
                               + out_pad * 4
                               + n_pad * out_pad * jnp.dtype(out_dtype).itemsize),
        )

        out_p = pl.pallas_call(
            kernel,
            out_shape=jax.ShapeDtypeStruct((n_pad, out_pad), out_dtype),
            grid_spec=pltpu.PrefetchScalarGridSpec(
                num_scalar_prefetch=0,
                grid=grid,
                in_specs=[
                    x_spec,                                             # x tile / K stripe
                    pl.BlockSpec((tk, tn), lambda i, j, k: (k, j)),     # streamed weight tile
                    pl.BlockSpec((1, tn), lambda i, j, k: (0, j)),      # bias row tile (f32)
                ],
                out_specs=pl.BlockSpec((tm, tn), lambda i, j, k: (i, j)),
                scratch_shapes=scratch,
            ),
            compiler_params=pltpu.CompilerParams(
                dimension_semantics=("parallel", "parallel", "arbitrary"),
                vmem_limit_bytes=self.vmem_limit,
            ),
            cost_estimate=cost,
        )(x_p, self.w_p, self.b2d)

        return out_p[:N, :self.out_dim]


def dense(x, weight, bias, **kwargs):
    """One-shot convenience wrapper. Prefer constructing `Dense` once and reusing
    it so the weight pad/cast is hoisted out of the hot path."""
    return Dense(weight, bias, **kwargs)(x)


if __name__ == "__main__":
    key = jax.random.PRNGKey(0)
    kx, kw, kb = jax.random.split(key, 3)

    # Small shapes consistent with the module's forward: x is [N, in_dim].
    N, in_dim, out_dim = 8, 32, 32
    x = jax.random.normal(kx, (N, in_dim), dtype=jnp.float32)
    weight = jax.random.uniform(kw, (in_dim, out_dim), dtype=jnp.float32,
                                minval=-0.05, maxval=0.05)
    bias = jax.random.uniform(kb, (out_dim,), dtype=jnp.float32,
                              minval=-0.05, maxval=0.05)
    ref = jnp.einsum("ni,io->no", x, weight) + bias

    # Parameters are padded/cast once at construction (hoisted out of forward).
    layer = Dense(weight, bias)
    out = layer(x, is_t=False)
    jax.block_until_ready(out)
    assert out.shape == (N, out_dim)
    tol = 1e-4 if layer.compute_dtype == jnp.dtype(jnp.float32) else 2e-2
    assert jnp.allclose(out, ref, atol=tol, rtol=tol)

    # Explicit bf16 compute path (f32 MXU accumulation; output keeps x.dtype).
    layer_bf16 = Dense(weight, bias, compute_dtype=jnp.bfloat16)
    out_bf16 = layer_bf16(x)
    jax.block_until_ready(out_bf16)
    assert out_bf16.dtype == x.dtype
    assert jnp.allclose(out_bf16, ref, atol=2e-2, rtol=2e-2)

    # Non-tile-aligned shapes exercise the padding / clamping path.
    N2, in2, out2 = 50, 40, 72
    kx2, kw2, kb2 = jax.random.split(jax.random.PRNGKey(1), 3)
    x2 = jax.random.normal(kx2, (N2, in2), dtype=jnp.float32)
    w2 = jax.random.uniform(kw2, (in2, out2), dtype=jnp.float32,
                            minval=-0.05, maxval=0.05)
    b2 = jax.random.uniform(kb2, (out2,), dtype=jnp.float32,
                            minval=-0.05, maxval=0.05)
    layer2 = Dense(w2, b2)
    out2_ = layer2(x2)
    jax.block_until_ready(out2_)
    ref2 = jnp.einsum("ni,io->no", x2, w2) + b2
    tol2 = 1e-4 if layer2.compute_dtype == jnp.dtype(jnp.float32) else 2e-2
    assert out2_.shape == (N2, out2)
    assert jnp.allclose(out2_, ref2, atol=tol2, rtol=tol2)

    # Multi-K-tile path (small tk) exercises the K-resident x stripe +
    # streaming-weight accumulation loop, plus the v7x 2-N-tile split.
    N3, in3, out3 = 64, 1024, 256
    kx3, kw3, kb3 = jax.random.split(jax.random.PRNGKey(2), 3)
    x3 = jax.random.normal(kx3, (N3, in3), dtype=jnp.float32)
    w3 = jax.random.uniform(kw3, (in3, out3), dtype=jnp.float32,
                            minval=-0.05, maxval=0.05)
    b3 = jax.random.uniform(kb3, (out3,), dtype=jnp.float32,
                            minval=-0.05, maxval=0.05)
    layer3 = Dense(w3, b3, tk=256)
    out3_ = layer3(x3)
    jax.block_until_ready(out3_)
    ref3 = jnp.einsum("ni,io->no", x3, w3) + b3
    tol3 = 1e-3 if layer3.compute_dtype == jnp.dtype(jnp.float32) else 6e-2
    assert out3_.shape == (N3, out3)
    assert jnp.allclose(out3_, ref3, atol=tol3, rtol=tol3)

    print("KERNEL_OK")
</pallas_src>

<mosaic_0001>
module attributes {stable_mosaic.version = 11 : i64} {
  func.func @kernel(%arg0: i32, %arg1: i32, %arg2: i32, %arg3: memref<8x128xf32, #tpu.memory_space<vmem>>, %arg4: memref<128x128xf32, #tpu.memory_space<vmem>>, %arg5: memref<1x128xf32, #tpu.memory_space<vmem>>, %arg6: memref<8x128xf32, #tpu.memory_space<vmem>>) attributes {dimension_semantics = [#tpu.dimension_semantics<parallel>, #tpu.dimension_semantics<parallel>, #tpu.dimension_semantics<arbitrary>], iteration_bounds = array<i64: 1, 1, 1>, scalar_prefetch = 0 : i64, scratch_operands = 0 : i64, tpu.core_type = #tpu.core_type<tc>, window_params = [{transform_indices = @transform_0, window_bounds = array<i64: 8, 128>}, {transform_indices = @transform_1, window_bounds = array<i64: 128, 128>}, {transform_indices = @transform_2, window_bounds = array<i64: 1, 128>}, {transform_indices = @transform_3, window_bounds = array<i64: 8, 128>}]} {
    %c0_i32 = arith.constant 0 : i32
    %0 = arith.cmpi eq, %arg2, %c0_i32 : i32
    %1 = arith.extui %0 : i1 to i32
    %c0_i32_0 = arith.constant 0 : i32
    %2 = arith.cmpi ne, %1, %c0_i32_0 : i32
    scf.if %2 {
      %cst_10 = arith.constant 0.000000e+00 : f32
      %12 = vector.broadcast %cst_10 : f32 to vector<8x128xf32>
      %c0_11 = arith.constant 0 : index
      %c0_12 = arith.constant 0 : index
      %13 = vector.load %arg6[%c0_11, %c0_12] : memref<8x128xf32, #tpu.memory_space<vmem>>, vector<8x128xf32>
      tpu.vector_store %arg6[%c0_11, %c0_12], %12 {strides = array<i32>} : memref<8x128xf32, #tpu.memory_space<vmem>>, vector<8x128xf32>,
    } else {
    }
    %c0 = arith.constant 0 : index
    %c0_1 = arith.constant 0 : index
    %3 = vector.load %arg3[%c0, %c0_1] : memref<8x128xf32, #tpu.memory_space<vmem>>, vector<8x128xf32>
    %c0_2 = arith.constant 0 : index
    %c0_3 = arith.constant 0 : index
    %4 = vector.load %arg6[%c0_2, %c0_3] : memref<8x128xf32, #tpu.memory_space<vmem>>, vector<8x128xf32>
    %c0_4 = arith.constant 0 : index
    %c0_5 = arith.constant 0 : index
    %5 = vector.load %arg4[%c0_4, %c0_5] : memref<128x128xf32, #tpu.memory_space<vmem>>, vector<128x128xf32>
    %cst = arith.constant dense<0.000000e+00> : vector<8x128xf32>
    %6 = tpu.matmul %3, %5, %cst {dimension_numbers = #tpu.dot_dimension_numbers<[1], [0], [0], [1], [0, 0, 1, 1], [], []>} : vector<8x128xf32>, vector<128x128xf32>, vector<8x128xf32> -> vector<8x128xf32>
    %7 = arith.addf %4, %6 : vector<8x128xf32>
    %c0_6 = arith.constant 0 : index
    %c0_7 = arith.constant 0 : index
    %8 = vector.load %arg6[%c0_6, %c0_7] : memref<8x128xf32, #tpu.memory_space<vmem>>, vector<8x128xf32>
    tpu.vector_store %arg6[%c0_6, %c0_7], %7 {strides = array<i32>} : memref<8x128xf32, #tpu.memory_space<vmem>>, vector<8x128xf32>,
    %c0_i32_8 = arith.constant 0 : i32
    %9 = arith.cmpi eq, %arg2, %c0_i32_8 : i32
    %10 = arith.extui %9 : i1 to i32
    %c0_i32_9 = arith.constant 0 : i32
    %11 = arith.cmpi ne, %10, %c0_i32_9 : i32
    scf.if %11 {
      %c0_10 = arith.constant 0 : index
      %c0_11 = arith.constant 0 : index
      %12 = vector.load %arg6[%c0_10, %c0_11] : memref<8x128xf32, #tpu.memory_space<vmem>>, vector<8x128xf32>
      %c0_12 = arith.constant 0 : index
      %c0_13 = arith.constant 0 : index
      %13 = vector.load %arg5[%c0_12, %c0_13] : memref<1x128xf32, #tpu.memory_space<vmem>>, vector<1x128xf32>
      %14 = vector.broadcast %13 : vector<1x128xf32> to vector<8x128xf32>
      %15 = arith.addf %12, %14 : vector<8x128xf32>
      %c0_14 = arith.constant 0 : index
      %c0_15 = arith.constant 0 : index
      %16 = vector.load %arg6[%c0_14, %c0_15] : memref<8x128xf32, #tpu.memory_space<vmem>>, vector<8x128xf32>
      tpu.vector_store %arg6[%c0_14, %c0_15], %15 {strides = array<i32>} : memref<8x128xf32, #tpu.memory_space<vmem>>, vector<8x128xf32>,
    } else {
    }
    return
  }
  func.func @transform_0(%arg0: i32, %arg1: i32, %arg2: i32) -> (i32, i32) {
    %c0_i32 = arith.constant 0 : i32
    return %arg0, %arg2 : i32, i32
  }
  func.func @transform_1(%arg0: i32, %arg1: i32, %arg2: i32) -> (i32, i32) {
    %c0_i32 = arith.constant 0 : i32
    return %arg2, %arg1 : i32, i32
  }
  func.func @transform_2(%arg0: i32, %arg1: i32, %arg2: i32) -> (i32, i32) {
    %c0_i32 = arith.constant 0 : i32
    %c0_i32_0 = arith.constant 0 : i32
    return %c0_i32, %arg1 : i32, i32
  }
  func.func @transform_3(%arg0: i32, %arg1: i32, %arg2: i32) -> (i32, i32) {
    %c0_i32 = arith.constant 0 : i32
    return %arg0, %arg1 : i32, i32
  }
}

</mosaic_0001>

<bundles_post_ra>
// kernel: tpu_custom_call.1
= control target key start
LH: loop header
LB: loop body
LE: loop exit
PB: predicated region body
PF: predicated region fallthrough
CT: control target
= control target key end

     0   :  { %8 = vsyncpa [#allocation3], 0  ;;  %s330_s0 = inlined_call_operand.hbm [shape: f32[8,128], index: 0, kind: input, shape index: {}]   ;;  %s331_s1 = inlined_call_operand.hbm [shape: f32[128,128], index: 1, kind: input, shape index: {}]   ;;  %s332_s2 = inlined_call_operand.vmem [shape: f32[1,128], index: 2, kind: input, shape index: {}]   ;;  %s333_s3 = inlined_call_operand.hbm [shape: f32[8,128], index: 3, kind: output, shape index: {}]  }
   0x1   :  { %9 = vsyncpa [#allocation6], 0 }
   0x2   :  { %10 = vsyncpa [#allocation4], 0  ;;  %s291_s12 = smov [#allocation2]   ;;  %s292_s14 = smov [#allocation5]  }
   0x3   :  { %s17_s13 = sshll.u32 %s291_s12, 4  ;;  %s26_s15 = sshll.u32 %s292_s14, 4  ;;  %s18_s13 = int_to_ptr.vmem [resolvable:$true] %s17_s13  ;;  %s27_s15 = int_to_ptr.vmem [resolvable:$true] %s26_s15 }
   0x4   :  { %s233_s16 = scalar_lea.vmem %s18_s13, 128  ;;  %p238_p1 = scmp.lt.s32.totalorder %s18_s13, %s18_s13 }
   0x5   :  { %p234_p0 = scmp.ne.s32.totalorder %s18_s13, %s233_s16  ;;  %p239_p2 = scmp.lt.s32.totalorder %s233_s16, %s233_s16 }
   0x7   :  { %p240_p3 = por %p239_p2, %p238_p1 }
   0x9   :  { %p241_p4 = pnand %p240_p3, %p234_p0 }
   0xb   :  { %244 = shalt.err (!%p241_p4)
}
   0xc   :  { %20 = dma.hbm_to_vmem [thread:$0]  %s330_s0, 128, %s18_s13, [#allocation3]  }
   0xd   :  { %s253_s19 = scalar_lea.vmem %s27_s15, 2048  ;;  %p258_p6 = scmp.lt.s32.totalorder %s27_s15, %s27_s15 }
   0xe   :  { %p254_p5 = scmp.ne.s32.totalorder %s27_s15, %s253_s19  ;;  %p259_p7 = scmp.lt.s32.totalorder %s253_s19, %s253_s19 }
  0x10   :  { %p260_p8 = por %p259_p7, %p258_p6 }
  0x12   :  { %p261_p9 = pnand %p260_p8, %p254_p5 }
  0x14   :  { %264 = shalt.err (!%p261_p9)
}
  0x15   :  { %s293_s20 = smov 128   ;;  %s294_s21 = smov 8  }
  0x16   :  { %32 = dma.hbm_to_vmem [thread:$0]  %s331_s1, 2048, %s27_s15, [#allocation6], %s293_s20, %s293_s20, %s294_s21  }
  0x17   :  { %285 = dma.done.wait [#allocation3], 128  }
  0x18   :  { %286 = vsyncadd [#allocation3], 4294967168 }
  0x19   :  { %287 = dma.done.wait [#allocation6], 2048  }
  0x1a   :  { %288 = vsyncadd [#allocation6], 4294965248  ;;  %v295_v0 = vmov 0.0   ;;  %vm296_vm0 = vmmov 0   ;;  %v63_v1 = vld [vmem:[#allocation5 + $0x78] sm:$0xff]  ;;  %v62_v2 = vld [vmem:[#allocation5 + $0x70] sm:$0xff] }
  0x1b   :  { %183 = vmatprep.subr.mxu0 %v295_v0  ;;  %215 = vmatprep.mubr.msk.f32.mxu0 %vm296_vm0, %v295_v0  ;;  %v61_v3 = vld [vmem:[#allocation5 + $0x68] sm:$0xff]  ;;  %v60_v4 = vld [vmem:[#allocation5 + $0x60] sm:$0xff]  ;;  %v59_v5 = vld [vmem:[#allocation5 + $0x58] sm:$0xff]  ;;  %s297_s24 = smov [#allocation7]  }
  0x1c   :  { %184 = vmatpush3.msra.mxu0 %v63_v1  ;;  %v58_v6 = vld [vmem:[#allocation5 + $0x50] sm:$0xff]  ;;  %v57_v7 = vld [vmem:[#allocation5 + $0x48] sm:$0xff]  ;;  %v56_v8 = vld [vmem:[#allocation5 + $0x40] sm:$0xff]  ;;  %s155_s25 = sshll.u32 %s297_s24, 4  ;;  %s156_s25 = int_to_ptr.vmem [resolvable:$true] %s155_s25 }
  0x1d   :  { %185 = vmatprep.subr.mxu0 %v295_v0  ;;  %v55_v9 = vld [vmem:[#allocation5 + $0x38] sm:$0xff]  ;;  %v54_v10 = vld [vmem:[#allocation5 + $0x30] sm:$0xff]  ;;  %v53_v11 = vld [vmem:[#allocation5 + $0x28] sm:$0xff]  ;;  %s265_s26 = scalar_lea.vmem %s156_s25, 128  ;;  %p270_p11 = scmp.lt.s32.totalorder %s156_s25, %s156_s25 }
  0x1e   :  { %186 = vmatpush3.msra.mxu0 %v62_v2  ;;  %v52_v12 = vld [vmem:[#allocation5 + $0x20] sm:$0xff]  ;;  %v51_v13 = vld [vmem:[#allocation5 + $0x18] sm:$0xff]  ;;  %v50_v14 = vld [vmem:[#allocation5 + $0x10] sm:$0xff]  ;;  %p266_p10 = scmp.ne.s32.totalorder %s156_s25, %s265_s26  ;;  %p271_p12 = scmp.lt.s32.totalorder %s265_s26, %s265_s26 }
  0x1f   :  { %187 = vmatprep.subr.mxu0 %v295_v0  ;;  %v49_v15 = vld [vmem:[#allocation5 + $0x8] sm:$0xff]  ;;  %v48_v16 = vld [vmem:[#allocation5] sm:$0xff]  ;;  %v46_v17 = vld [vmem:[#allocation2] sm:$0xff] }
  0x20   :  { %188 = vmatpush3.msra.mxu0 %v61_v3  ;;  %v165_v19 = vld [vmem:[%s332_s2] ss:$0 sm:$0xff]  ;;  %p272_p13 = por %p271_p12, %p270_p11 }
  0x21   :  { %189 = vmatprep.subr.mxu0 %v295_v0 }
  0x22   :  { %190 = vmatpush3.msra.mxu0 %v60_v4  ;;  %p273_p0 = pnand %p272_p13, %p266_p10 }
  0x23   :  { %191 = vmatprep.subr.mxu0 %v295_v0 }
  0x24   :  { %192 = vmatpush3.msra.mxu0 %v59_v5 }
  0x25   :  { %193 = vmatprep.subr.mxu0 %v295_v0 }
  0x26   :  { %194 = vmatpush3.msra.mxu0 %v58_v6 }
  0x27   :  { %195 = vmatprep.subr.mxu0 %v295_v0 }
  0x28   :  { %196 = vmatpush3.msra.mxu0 %v57_v7 }
  0x29   :  { %197 = vmatprep.subr.mxu0 %v295_v0 }
  0x2a   :  { %198 = vmatpush3.msra.mxu0 %v56_v8 }
  0x2b   :  { %199 = vmatprep.subr.mxu0 %v295_v0 }
  0x2c   :  { %200 = vmatpush3.msra.mxu0 %v55_v9 }
  0x2d   :  { %201 = vmatprep.subr.mxu0 %v295_v0 }
  0x2e   :  { %202 = vmatpush3.msra.mxu0 %v54_v10 }
  0x2f   :  { %203 = vmatprep.subr.mxu0 %v295_v0 }
  0x30   :  { %204 = vmatpush3.msra.mxu0 %v53_v11 }
  0x31   :  { %205 = vmatprep.subr.mxu0 %v295_v0 }
  0x32   :  { %206 = vmatpush3.msra.mxu0 %v52_v12 }
  0x33   :  { %207 = vmatprep.subr.mxu0 %v295_v0 }
  0x34   :  { %208 = vmatpush3.msra.mxu0 %v51_v13 }
  0x35   :  { %209 = vmatprep.subr.mxu0 %v295_v0 }
  0x36   :  { %210 = vmatpush3.msra.mxu0 %v50_v14 }
  0x37   :  { %211 = vmatprep.subr.mxu0 %v295_v0 }
  0x38   :  { %212 = vmatpush3.msra.mxu0 %v49_v15 }
  0x39   :  { %213 = vmatprep.subr.mxu0 %v295_v0 }
  0x3a   :  { %214 = vmatpush3.msra.mxu0 %v48_v16 }
  0x3b   :  { %216 = vmatmul.mubr.f32.vlgmr.msra.gmra.mxu0 %v46_v17 }
  0xfb   :  { %v130_v18 = vpop.f32.mrf.mxu0 }
  0xfc   :  { %v147_v21 = vadd.f32 %v165_v19, %v130_v18 }
  0xfd   :  { %v217_v20 = vpop.f32.mrf.mxu0 }
  0xfe   :  { %148 = vst [vmem:[#allocation7] sm:$0xff] %v147_v21 }
  0xff   :  { %276 = shalt.err (!%p273_p0)
}
 0x100   :  { %158 = dma.vmem_to_hbm [thread:$0]  %s156_s25, 128, %s333_s3, [#allocation4]  }
 0x101   :  { %289 = dma.done.wait [#allocation4], 128  }
 0x102   :  { %290 = vsyncadd [#allocation4], 4294967168 }
 0x103   :  { %162 = vsyncpa [#allocation3], 1 }
 0x104   :  { %163 = vsyncpa [#allocation6], 1 }
 0x105   :  { %164 = vsyncpa [#allocation4], 1 }

</bundles_post_ra>
